<compile_context>
chip_gen: v7x
topology: tpu7x:2x2x1
jax: 0.10.0
libtpu: 0.0.40
codegen_flags: <defaults>
</compile_context>

<pallas_src>
import math
from functools import partial

import jax
import jax.numpy as jnp
from jax.experimental import pallas as pl
from jax.experimental.pallas import tpu as pltpu

NEG_INF = -1e9
# Conservative budget that fits v7x's 64 MiB physical VMEM with headroom; with
# bf16 weights the tiles below stay far under it on v5e/v6e as well.
VMEM_LIMIT = 48 * 1024 * 1024


# ----------------------------------------------------------------------------- helpers
def _tile(n, target, step):
    """Largest multiple of `step` that divides n and is <= target; else full n."""
    t = min(target, n)
    t = (t // step) * step
    while t >= step:
        if n % t == 0:
            return t
        t -= step
    return n


def _cparams(*sem):
    return pltpu.CompilerParams(dimension_semantics=sem, vmem_limit_bytes=VMEM_LIMIT)


# ----------------------------------------------------------------------------- LN + linear (QKV projection)
def _ln_linear_kernel(x_ref, g_ref, b_ref, w_ref, bias_ref, o_ref, xn_ref):
    # LN is computed once per row tile (j == 0) into a bf16 scratch and reused
    # for every output-column tile j.
    @pl.when(pl.program_id(1) == 0)
    def _():
        x = x_ref[...]
        mu = jnp.mean(x, axis=-1, keepdims=True)
        var = jnp.mean((x - mu) ** 2, axis=-1, keepdims=True)
        xn = (x - mu) * jax.lax.rsqrt(var + 1e-5) * g_ref[...] + b_ref[...]
        xn_ref[...] = xn.astype(jnp.bfloat16)

    o_ref[...] = (
        jnp.dot(xn_ref[...], w_ref[...], preferred_element_type=jnp.float32)
        + bias_ref[...]
    )


def ln_linear(x, gamma, beta, w_bf16, bias):
    n, d = x.shape
    dout = w_bf16.shape[1]
    tm = _tile(n, 256, 8)
    tn = _tile(dout, 512, 128)
    return pl.pallas_call(
        _ln_linear_kernel,
        out_shape=jax.ShapeDtypeStruct((n, dout), jnp.float32),
        grid=(n // tm, dout // tn),
        in_specs=[
            pl.BlockSpec((tm, d), lambda i, j: (i, 0)),
            pl.BlockSpec((1, d), lambda i, j: (0, 0)),
            pl.BlockSpec((1, d), lambda i, j: (0, 0)),
            pl.BlockSpec((d, tn), lambda i, j: (0, j)),
            pl.BlockSpec((1, tn), lambda i, j: (0, j)),
        ],
        out_specs=pl.BlockSpec((tm, tn), lambda i, j: (i, j)),
        scratch_shapes=[pltpu.VMEM((tm, d), jnp.bfloat16)],
        compiler_params=_cparams("parallel", "arbitrary"),
    )(x, gamma.reshape(1, d), beta.reshape(1, d), w_bf16, bias.reshape(1, dout))


# ----------------------------------------------------------------------------- linear + residual (attention output proj)
def _linear_res_kernel(x_ref, w_ref, bias_ref, res_ref, o_ref):
    o_ref[...] = (
        jnp.dot(x_ref[...].astype(jnp.bfloat16), w_ref[...],
                preferred_element_type=jnp.float32)
        + bias_ref[...]
        + res_ref[...]
    )


def linear_residual(x, w_bf16, bias, res):
    n, d = x.shape
    dout = w_bf16.shape[1]
    tm = _tile(n, 256, 8)
    tn = _tile(dout, 512, 128)
    return pl.pallas_call(
        _linear_res_kernel,
        out_shape=jax.ShapeDtypeStruct((n, dout), jnp.float32),
        grid=(n // tm, dout // tn),
        in_specs=[
            pl.BlockSpec((tm, d), lambda i, j: (i, 0)),
            pl.BlockSpec((d, tn), lambda i, j: (0, j)),
            pl.BlockSpec((1, tn), lambda i, j: (0, j)),
            pl.BlockSpec((tm, tn), lambda i, j: (i, j)),
        ],
        out_specs=pl.BlockSpec((tm, tn), lambda i, j: (i, j)),
        compiler_params=_cparams("parallel", "parallel"),
    )(x, w_bf16, bias.reshape(1, dout), res)


# ----------------------------------------------------------------------------- LN + MLP + residual (K-reduction over hidden dim)
def _ln_mlp_res_kernel(x_ref, g_ref, b_ref, w1_ref, b1_ref, w2_ref, b2_ref,
                       o_ref, xn_ref, acc_ref):
    kk = pl.program_id(1)

    @pl.when(kk == 0)
    def _():
        x = x_ref[...]
        mu = jnp.mean(x, axis=-1, keepdims=True)
        var = jnp.mean((x - mu) ** 2, axis=-1, keepdims=True)
        xn = (x - mu) * jax.lax.rsqrt(var + 1e-5) * g_ref[...] + b_ref[...]
        xn_ref[...] = xn.astype(jnp.bfloat16)
        acc_ref[...] = jnp.zeros_like(acc_ref)

    # fc matmul + tanh-GELU done exactly once per (row tile, K tile).
    h = jnp.dot(xn_ref[...], w1_ref[...], preferred_element_type=jnp.float32)
    h = h + b1_ref[...]
    c = math.sqrt(2.0 / math.pi)  # GPT2 "gelu_new" (tanh approximation), f32
    h = 0.5 * h * (1.0 + jnp.tanh(c * (h + 0.044715 * h ** 3)))
    acc_ref[...] += jnp.dot(h.astype(jnp.bfloat16), w2_ref[...],
                            preferred_element_type=jnp.float32)

    @pl.when(kk == pl.num_programs(1) - 1)
    def _():
        # residual = the pre-LN input rows, already resident in VMEM (no extra stream)
        o_ref[...] = acc_ref[...] + b2_ref[...] + x_ref[...]


def ln_mlp_residual(x, gamma, beta, w1_bf16, b1, w2_bf16, b2):
    n, d = x.shape
    dhid = w1_bf16.shape[1]
    tm = _tile(n, 256, 8)
    tk = _tile(dhid, 512, 128)
    return pl.pallas_call(
        _ln_mlp_res_kernel,
        out_shape=jax.ShapeDtypeStruct((n, d), jnp.float32),
        grid=(n // tm, dhid // tk),
        in_specs=[
            pl.BlockSpec((tm, d), lambda i, k: (i, 0)),
            pl.BlockSpec((1, d), lambda i, k: (0, 0)),
            pl.BlockSpec((1, d), lambda i, k: (0, 0)),
            pl.BlockSpec((d, tk), lambda i, k: (0, k)),
            pl.BlockSpec((1, tk), lambda i, k: (0, k)),
            pl.BlockSpec((tk, d), lambda i, k: (k, 0)),
            pl.BlockSpec((1, d), lambda i, k: (0, 0)),
        ],
        out_specs=pl.BlockSpec((tm, d), lambda i, k: (i, 0)),
        scratch_shapes=[pltpu.VMEM((tm, d), jnp.bfloat16),
                        pltpu.VMEM((tm, d), jnp.float32)],
        compiler_params=_cparams("parallel", "arbitrary"),
    )(x, gamma.reshape(1, d), beta.reshape(1, d), w1_bf16, b1.reshape(1, dhid),
      w2_bf16, b2.reshape(1, d))


# ----------------------------------------------------------------------------- attention (head split/merge folded into the kernel)
def _attention_kernel(qkv_q_ref, qkv_kv_ref, m_ref, o_ref, *, n_head, d_model, tq):
    qi = pl.program_id(1)
    dh = d_model // n_head
    qrows = qkv_q_ref[0]          # (tq, 3D)
    krows = qkv_kv_ref[0]         # (S,  3D)
    s_len = krows.shape[0]
    mask_row = m_ref[0]           # (1, S)

    # causal + key-padding mask built in-kernel (no [B*H, S, S] HBM tensor)
    qpos = qi * tq + jax.lax.broadcasted_iota(jnp.int32, (tq, s_len), 0)
    kpos = jax.lax.broadcasted_iota(jnp.int32, (tq, s_len), 1)
    allowed = (kpos <= qpos) & (mask_row > 0.0)

    outs = []
    for h in range(n_head):       # small static unroll; per-head 2-D MXU matmuls
        q = qrows[:, h * dh:(h + 1) * dh].astype(jnp.bfloat16)
        k = krows[:, d_model + h * dh: d_model + (h + 1) * dh].astype(jnp.bfloat16)
        v = krows[:, 2 * d_model + h * dh: 2 * d_model + (h + 1) * dh].astype(jnp.bfloat16)

        # 1/sqrt(dh) is already folded into the Q weights on the host.
        s = jax.lax.dot_general(q, k, (((1,), (1,)), ((), ())),
                                preferred_element_type=jnp.float32)
        s = jnp.where(allowed, s, NEG_INF)
        s = s - jnp.max(s, axis=-1, keepdims=True)
        p = jnp.exp(s)
        denom = jnp.sum(p, axis=-1, keepdims=True)
        o = jnp.dot(p.astype(jnp.bfloat16), v, preferred_element_type=jnp.float32)
        outs.append(o * pl.reciprocal(denom, approx=True))

    # single lane-dense store of the merged [tq, D] head outputs
    o_ref[0] = jnp.concatenate(outs, axis=-1)


def attention(qkv, key_mask, n_head, d_model):
    B, S, threeD = qkv.shape
    tq = _tile(S, 256, 8)
    return pl.pallas_call(
        partial(_attention_kernel, n_head=n_head, d_model=d_model, tq=tq),
        out_shape=jax.ShapeDtypeStruct((B, S, d_model), jnp.float32),
        grid=(B, S // tq),
        in_specs=[
            pl.BlockSpec((1, tq, threeD), lambda b, i: (b, i, 0)),   # Q rows
            pl.BlockSpec((1, S, threeD), lambda b, i: (b, 0, 0)),    # K/V rows
            pl.BlockSpec((1, 1, S), lambda b, i: (b, 0, 0)),         # key padding
        ],
        out_specs=pl.BlockSpec((1, tq, d_model), lambda b, i: (b, i, 0)),
        compiler_params=_cparams("parallel", "parallel"),
    )(qkv, qkv, key_mask)


# ----------------------------------------------------------------------------- ln_f + Projection + L2-normalize (EOS rows only)
def _projection_kernel(x_ref, lg_ref, lb_ref, w1_ref, w2_ref, g_ref, b_ref, o_ref):
    # GPT2 ln_f applied to the gathered EOS rows (LN commutes with the row gather),
    # then Projection.forward (dropout = identity, eval) + L2 normalization, fused.
    x = x_ref[...]
    mu = jnp.mean(x, axis=-1, keepdims=True)
    var = jnp.mean((x - mu) ** 2, axis=-1, keepdims=True)
    x = (x - mu) * jax.lax.rsqrt(var + 1e-5) * lg_ref[...] + lb_ref[...]

    e1 = jnp.dot(x.astype(jnp.bfloat16), w1_ref[...],
                 preferred_element_type=jnp.float32)
    g = e1 * jax.nn.sigmoid(1.702 * e1)                        # Projection.gelu
    e2 = jnp.dot(g.astype(jnp.bfloat16), w2_ref[...],
                 preferred_element_type=jnp.float32)
    y = e1 + e2
    mu = jnp.mean(y, axis=-1, keepdims=True)
    var = jnp.mean((y - mu) ** 2, axis=-1, keepdims=True)
    y = (y - mu) * jax.lax.rsqrt(var + 1e-5) * g_ref[...] + b_ref[...]
    # x / torch.norm(x, dim=-1, keepdim=True)
    o_ref[...] = y * jax.lax.rsqrt(jnp.sum(y * y, axis=-1, keepdims=True))


def projection_normalize(x, lnf_g, lnf_b, w1_bf16, w2_bf16, gamma, beta):
    n, d_in = x.shape
    d_out = w1_bf16.shape[1]
    tm = _tile(n, 256, 8)
    return pl.pallas_call(
        _projection_kernel,
        out_shape=jax.ShapeDtypeStruct((n, d_out), jnp.float32),
        grid=(n // tm,),
        in_specs=[
            pl.BlockSpec((tm, d_in), lambda i: (i, 0)),
            pl.BlockSpec((1, d_in), lambda i: (0, 0)),
            pl.BlockSpec((1, d_in), lambda i: (0, 0)),
            pl.BlockSpec((d_in, d_out), lambda i: (0, 0)),
            pl.BlockSpec((d_out, d_out), lambda i: (0, 0)),
            pl.BlockSpec((1, d_out), lambda i: (0, 0)),
            pl.BlockSpec((1, d_out), lambda i: (0, 0)),
        ],
        out_specs=pl.BlockSpec((tm, d_out), lambda i: (i, 0)),
        compiler_params=_cparams("parallel"),
    )(x, lnf_g.reshape(1, d_in), lnf_b.reshape(1, d_in), w1_bf16, w2_bf16,
      gamma.reshape(1, d_out), beta.reshape(1, d_out))


# ----------------------------------------------------------------------------- parameter construction / host-side prep
def init_params(key, *, vocab, max_pos, d_model, n_head, n_layer, d_out):
    ks = iter(jax.random.split(key, 8 + 8 * n_layer))
    scale = 0.02

    def nrm(shape):
        return scale * jax.random.normal(next(ks), shape, dtype=jnp.float32)

    layers = []
    for _ in range(n_layer):
        layers.append(dict(
            ln1_g=jnp.ones((d_model,), jnp.float32),
            ln1_b=jnp.zeros((d_model,), jnp.float32),
            attn_w=nrm((d_model, 3 * d_model)),
            attn_b=jnp.zeros((3 * d_model,), jnp.float32),
            proj_w=nrm((d_model, d_model)),
            proj_b=jnp.zeros((d_model,), jnp.float32),
            ln2_g=jnp.ones((d_model,), jnp.float32),
            ln2_b=jnp.zeros((d_model,), jnp.float32),
            fc_w=nrm((d_model, 4 * d_model)),
            fc_b=jnp.zeros((4 * d_model,), jnp.float32),
            mlp_proj_w=nrm((4 * d_model, d_model)),
            mlp_proj_b=jnp.zeros((d_model,), jnp.float32),
        ))
    return dict(
        wte=nrm((vocab, d_model)),
        wpe=nrm((max_pos, d_model)),
        layers=layers,
        lnf_g=jnp.ones((d_model,), jnp.float32),
        lnf_b=jnp.zeros((d_model,), jnp.float32),
        n_head=n_head,
        proj_w1=nrm((d_model, d_out)),
        proj_w2=nrm((d_out, d_out)),
        proj_ln_g=jnp.ones((d_out,), jnp.float32),
        proj_ln_b=jnp.zeros((d_out,), jnp.float32),
    )


def prepare_params(params):
    """One-time host prep: fold 1/sqrt(head_dim) into the Q columns of the QKV
    projection and pre-cast all matmul weights to bf16 (biases/LN stay f32)."""
    d_model = params["wte"].shape[1]
    scale = 1.0 / math.sqrt(d_model // params["n_head"])
    out = dict(params)
    layers = []
    for layer in params["layers"]:
        l = dict(layer)
        attn_w = layer["attn_w"].at[:, :d_model].multiply(scale)
        attn_b = layer["attn_b"].at[:d_model].multiply(scale)
        l["attn_w"] = attn_w.astype(jnp.bfloat16)
        l["attn_b"] = attn_b
        l["proj_w"] = layer["proj_w"].astype(jnp.bfloat16)
        l["fc_w"] = layer["fc_w"].astype(jnp.bfloat16)
        l["mlp_proj_w"] = layer["mlp_proj_w"].astype(jnp.bfloat16)
        layers.append(l)
    out["layers"] = layers
    out["proj_w1"] = params["proj_w1"].astype(jnp.bfloat16)
    out["proj_w2"] = params["proj_w2"].astype(jnp.bfloat16)
    return out


# ----------------------------------------------------------------------------- GPT2 backbone
def gpt2_forward(params, input_ids, attention_mask):
    B, S = input_ids.shape
    D = params["wte"].shape[1]
    H = params["n_head"]

    # embedding lookup stays in plain JAX (gather)
    h = params["wte"][input_ids] + params["wpe"][jnp.arange(S)][None]   # [B, S, D]
    h = h.reshape(B * S, D)

    # tiny key-padding mask [B, 1, S]; causal part is generated inside the kernel.
    key_mask = attention_mask.astype(jnp.float32).reshape(B, 1, S)

    for layer in params["layers"]:
        # LN1 fused into the QKV projection (scale folded into Q weights)
        qkv = ln_linear(h, layer["ln1_g"], layer["ln1_b"],
                        layer["attn_w"], layer["attn_b"])                # [B*S, 3D]

        # attention reads q/k/v straight from [B, S, 3D] and writes merged [B, S, D]
        a = attention(qkv.reshape(B, S, 3 * D), key_mask, H, D)

        # attention output projection + residual add, fused
        h = linear_residual(a.reshape(B * S, D), layer["proj_w"],
                            layer["proj_b"], h)

        # LN2 + MLP + residual, fused (K-reduction over the 4D hidden dim);
        # the residual is taken from the kernel's own x tile (no extra stream).
        h = ln_mlp_residual(h, layer["ln2_g"], layer["ln2_b"],
                            layer["fc_w"], layer["fc_b"],
                            layer["mlp_proj_w"], layer["mlp_proj_b"])

    return h.reshape(B, S, D)


class RUGPTTextEncoderPallas:
    """Pallas equivalent of RUGPTTextEncoder.forward (inference semantics)."""

    def __init__(self, params, eos_token_id):
        self.params = prepare_params(params)
        self.eos_token_id = eos_token_id

    def __call__(self, input_ids, attention_mask):
        B = input_ids.shape[0]
        hidden = gpt2_forward(self.params, input_ids, attention_mask)    # [B, S, D]
        # x[(x == eos).nonzero(as_tuple=True)] -> one EOS per sequence (tokenizer
        # guarantees exactly one), so first-match gather is equivalent.
        eos_pos = jnp.argmax(input_ids == self.eos_token_id, axis=1)
        sel = hidden[jnp.arange(B), eos_pos]                             # [B, D]
        p = self.params
        # ln_f + Projection + L2 normalization, fused in one kernel on B rows.
        return projection_normalize(
            sel, p["lnf_g"], p["lnf_b"],
            p["proj_w1"], p["proj_w2"], p["proj_ln_g"], p["proj_ln_b"])


# ----------------------------------------------------------------------------- main
if __name__ == "__main__":
    B, S = 2, 8
    VOCAB, MAX_POS = 64, 16
    D_IN, N_HEAD, N_LAYER = 32, 4, 2
    D_OUT = 16
    EOS_ID = 2

    root = jax.random.PRNGKey(0)
    k_params, k_ids = jax.random.split(root)

    params = init_params(
        k_params, vocab=VOCAB, max_pos=MAX_POS,
        d_model=D_IN, n_head=N_HEAD, n_layer=N_LAYER, d_out=D_OUT,
    )

    # deterministic synthetic token ids with exactly one EOS per sequence
    input_ids = jax.random.randint(k_ids, (B, S), 3, VOCAB, dtype=jnp.int32)
    eos_positions = jnp.array([5, 3], dtype=jnp.int32)
    input_ids = input_ids.at[jnp.arange(B), eos_positions].set(EOS_ID)
    # valid lengths 6 and 4 (EOS inside the valid region)
    lengths = jnp.array([6, 4], dtype=jnp.int32)
    attention_mask = (jnp.arange(S)[None, :] < lengths[:, None]).astype(jnp.int32)

    encoder = RUGPTTextEncoderPallas(params, EOS_ID)
    out = encoder(input_ids, attention_mask)
    out = jax.block_until_ready(out)

    assert out.shape == (B, D_OUT), out.shape
    assert bool(jnp.all(jnp.isfinite(out)))
    # rows are L2-normalized
    norms = jnp.linalg.norm(out, axis=-1)
    assert bool(jnp.allclose(norms, 1.0, atol=1e-4)), norms
    print("KERNEL_OK")
</pallas_src>

<mosaic_0001>
module attributes {stable_mosaic.version = 11 : i64} {
  func.func @_ln_linear_kernel(%arg0: i32, %arg1: i32, %arg2: memref<16x32xf32, #tpu.memory_space<vmem>>, %arg3: memref<1x32xf32, #tpu.memory_space<vmem>>, %arg4: memref<1x32xf32, #tpu.memory_space<vmem>>, %arg5: memref<32x96xbf16, #tpu.memory_space<vmem>>, %arg6: memref<1x96xf32, #tpu.memory_space<vmem>>, %arg7: memref<16x96xf32, #tpu.memory_space<vmem>>, %arg8: memref<16x32xbf16, #tpu.memory_space<vmem>>) attributes {dimension_semantics = [#tpu.dimension_semantics<parallel>, #tpu.dimension_semantics<arbitrary>], iteration_bounds = array<i64: 1, 1>, scalar_prefetch = 0 : i64, scratch_operands = 1 : i64, tpu.core_type = #tpu.core_type<tc>, window_params = [{transform_indices = @transform_0, window_bounds = array<i64: 16, 32>}, {pipeline_mode = #tpu.pipeline_mode<synchronous>, transform_indices = @transform_1, window_bounds = array<i64: 1, 32>}, {pipeline_mode = #tpu.pipeline_mode<synchronous>, transform_indices = @transform_2, window_bounds = array<i64: 1, 32>}, {transform_indices = @transform_3, window_bounds = array<i64: 32, 96>}, {transform_indices = @transform_4, window_bounds = array<i64: 1, 96>}, {transform_indices = @transform_5, window_bounds = array<i64: 16, 96>}]} {
    %c0_i32 = arith.constant 0 : i32
    %0 = arith.cmpi eq, %arg1, %c0_i32 : i32
    %1 = arith.extui %0 : i1 to i32
    %c0_i32_0 = arith.constant 0 : i32
    %2 = arith.cmpi ne, %1, %c0_i32_0 : i32
    scf.if %2 {
      %c0_8 = arith.constant 0 : index
      %c0_9 = arith.constant 0 : index
      %10 = vector.load %arg2[%c0_8, %c0_9] : memref<16x32xf32, #tpu.memory_space<vmem>>, vector<16x32xf32>
      %cst_10 = arith.constant dense<0.000000e+00> : vector<16xf32>
      %11 = vector.multi_reduction <add>, %10, %cst_10 [1] : vector<16x32xf32> to vector<16xf32>
      %12 = vector.shape_cast %11 : vector<16xf32> to vector<16x1xf32>
      %cst_11 = arith.constant 3.200000e+01 : f32
      %13 = vector.broadcast %cst_11 : f32 to vector<16x1xf32>
      %14 = arith.divf %12, %13 : vector<16x1xf32>
      %15 = vector.broadcast %14 : vector<16x1xf32> to vector<16x32xf32>
      %16 = arith.subf %10, %15 : vector<16x32xf32>
      %17 = arith.mulf %16, %16 : vector<16x32xf32>
      %cst_12 = arith.constant dense<0.000000e+00> : vector<16xf32>
      %18 = vector.multi_reduction <add>, %17, %cst_12 [1] : vector<16x32xf32> to vector<16xf32>
      %19 = vector.shape_cast %18 : vector<16xf32> to vector<16x1xf32>
      %cst_13 = arith.constant 3.200000e+01 : f32
      %20 = vector.broadcast %cst_13 : f32 to vector<16x1xf32>
      %21 = arith.divf %19, %20 : vector<16x1xf32>
      %22 = vector.broadcast %14 : vector<16x1xf32> to vector<16x32xf32>
      %23 = arith.subf %10, %22 : vector<16x32xf32>
      %cst_14 = arith.constant 9.99999974E-6 : f32
      %24 = vector.broadcast %cst_14 : f32 to vector<16x1xf32>
      %25 = arith.addf %21, %24 : vector<16x1xf32>
      %26 = math.rsqrt %25 : vector<16x1xf32>
      %27 = vector.broadcast %26 : vector<16x1xf32> to vector<16x32xf32>
      %28 = arith.mulf %23, %27 : vector<16x32xf32>
      %c0_15 = arith.constant 0 : index
      %c0_16 = arith.constant 0 : index
      %29 = vector.load %arg3[%c0_15, %c0_16] : memref<1x32xf32, #tpu.memory_space<vmem>>, vector<1x32xf32>
      %30 = vector.broadcast %29 : vector<1x32xf32> to vector<16x32xf32>
      %31 = arith.mulf %28, %30 : vector<16x32xf32>
      %c0_17 = arith.constant 0 : index
      %c0_18 = arith.constant 0 : index
      %32 = vector.load %arg4[%c0_17, %c0_18] : memref<1x32xf32, #tpu.memory_space<vmem>>, vector<1x32xf32>
      %33 = vector.broadcast %32 : vector<1x32xf32> to vector<16x32xf32>
      %34 = arith.addf %31, %33 : vector<16x32xf32>
      %35 = arith.truncf %34 : vector<16x32xf32> to vector<16x32xbf16>
      %c0_19 = arith.constant 0 : index
      %c0_20 = arith.constant 0 : index
      %36 = vector.load %arg8[%c0_19, %c0_20] : memref<16x32xbf16, #tpu.memory_space<vmem>>, vector<16x32xbf16>
      tpu.vector_store %arg8[%c0_19, %c0_20], %35 {strides = array<i32>} : memref<16x32xbf16, #tpu.memory_space<vmem>>, vector<16x32xbf16>,
    } else {
    }
    %c0 = arith.constant 0 : index
    %c0_1 = arith.constant 0 : index
    %3 = vector.load %arg8[%c0, %c0_1] : memref<16x32xbf16, #tpu.memory_space<vmem>>, vector<16x32xbf16>
    %c0_2 = arith.constant 0 : index
    %c0_3 = arith.constant 0 : index
    %4 = vector.load %arg5[%c0_2, %c0_3] : memref<32x96xbf16, #tpu.memory_space<vmem>>, vector<32x96xbf16>
    %cst = arith.constant dense<0.000000e+00> : vector<16x96xf32>
    %5 = tpu.matmul %3, %4, %cst {dimension_numbers = #tpu.dot_dimension_numbers<[1], [0], [0], [1], [0, 0, 1, 1], [], []>} : vector<16x32xbf16>, vector<32x96xbf16>, vector<16x96xf32> -> vector<16x96xf32>
    %c0_4 = arith.constant 0 : index
    %c0_5 = arith.constant 0 : index
    %6 = vector.load %arg6[%c0_4, %c0_5] : memref<1x96xf32, #tpu.memory_space<vmem>>, vector<1x96xf32>
    %7 = vector.broadcast %6 : vector<1x96xf32> to vector<16x96xf32>
    %8 = arith.addf %5, %7 : vector<16x96xf32>
    %c0_6 = arith.constant 0 : index
    %c0_7 = arith.constant 0 : index
    %9 = vector.load %arg7[%c0_6, %c0_7] : memref<16x96xf32, #tpu.memory_space<vmem>>, vector<16x96xf32>
    tpu.vector_store %arg7[%c0_6, %c0_7], %8 {strides = array<i32>} : memref<16x96xf32, #tpu.memory_space<vmem>>, vector<16x96xf32>,
    return
  }
  func.func @transform_0(%arg0: i32, %arg1: i32) -> (i32, i32) {
    %c0_i32 = arith.constant 0 : i32
    %c0_i32_0 = arith.constant 0 : i32
    return %arg0, %c0_i32 : i32, i32
  }
  func.func @transform_1(%arg0: i32, %arg1: i32) -> (i32, i32) {
    %c0_i32 = arith.constant 0 : i32
    %c0_i32_0 = arith.constant 0 : i32
    %c0_i32_1 = arith.constant 0 : i32
    return %c0_i32, %c0_i32_0 : i32, i32
  }
  func.func @transform_2(%arg0: i32, %arg1: i32) -> (i32, i32) {
    %c0_i32 = arith.constant 0 : i32
    %c0_i32_0 = arith.constant 0 : i32
    %c0_i32_1 = arith.constant 0 : i32
    return %c0_i32, %c0_i32_0 : i32, i32
  }
  func.func @transform_3(%arg0: i32, %arg1: i32) -> (i32, i32) {
    %c0_i32 = arith.constant 0 : i32
    %c0_i32_0 = arith.constant 0 : i32
    return %c0_i32, %arg1 : i32, i32
  }
  func.func @transform_4(%arg0: i32, %arg1: i32) -> (i32, i32) {
    %c0_i32 = arith.constant 0 : i32
    %c0_i32_0 = arith.constant 0 : i32
    return %c0_i32, %arg1 : i32, i32
  }
  func.func @transform_5(%arg0: i32, %arg1: i32) -> (i32, i32) {
    %c0_i32 = arith.constant 0 : i32
    return %arg0, %arg1 : i32, i32
  }
}

</mosaic_0001>

<bundles_post_ra>
// kernel: tpu_custom_call.1
= control target key start
LH: loop header
LB: loop body
LE: loop exit
PB: predicated region body
PF: predicated region fallthrough
CT: control target
= control target key end

     0   :  { %10 = vsyncpa [#allocation4], 0  ;;  %s394_s0 = inlined_call_operand.hbm [shape: f32[16,32], index: 0, kind: input, shape index: {}]   ;;  %s395_s1 = inlined_call_operand.vmem [shape: f32[1,32], index: 1, kind: input, shape index: {}]   ;;  %s396_s2 = inlined_call_operand.vmem [shape: f32[1,32], index: 2, kind: input, shape index: {}]   ;;  %s397_s3 = inlined_call_operand.hbm [shape: bf16[32,96], index: 3, kind: input, shape index: {}]   ;;  %s398_s4 = inlined_call_operand.vmem [shape: f32[1,96], index: 4, kind: input, shape index: {}]   ;;  %s399_s5 = inlined_call_operand.hbm [shape: f32[16,96], index: 5, kind: output, shape index: {}]  }
   0x1   :  { %11 = vsyncpa [#allocation7], 0 }
   0x2   :  { %12 = vsyncpa [#allocation5], 0  ;;  %s298_s18 = smov [#allocation3]   ;;  %s226_s22 = scalar_lea.hbm %s394_s0, 256 }
   0x3   :  { %s18_s19 = sshll.u32 %s298_s18, 4  ;;  %p227_p0 = scmp.ne.s32.totalorder %s394_s0, %s226_s22  ;;  %s19_s19 = int_to_ptr.vmem [resolvable:$true] %s18_s19 }
   0x4   :  { %p230_p1 = scmp.lt.u32.totalorder %s226_s22, %s394_s0 }
   0x6   :  { %p232_p2 = pnand %p230_p1, %p227_p0 }
   0x8   :  { %235 = shalt.err (!%p232_p2)
}
   0x9   :  { %s236_s27 = scalar_lea.vmem %s19_s19, 256  ;;  %p241_p4 = scmp.lt.s32.totalorder %s19_s19, %s19_s19 }
   0xa   :  { %p237_p3 = scmp.ne.s32.totalorder %s19_s19, %s236_s27  ;;  %p242_p5 = scmp.lt.s32.totalorder %s236_s27, %s236_s27 }
   0xc   :  { %p243_p6 = por %p242_p5, %p241_p4 }
   0xe   :  { %p244_p7 = pnand %p243_p6, %p237_p3 }
  0x10   :  { %247 = shalt.err (!%p244_p7)
}
  0x11   :  { %s299_s28 = smov 128   ;;  %s300_s29 = smov 8  }
  0x12   :  { %24 = dma.hbm_to_vmem [thread:$0]  %s394_s0, 256, %s19_s19, [#allocation4], %s299_s28, %s299_s28, %s300_s29  }
  0x13   :  { %s301_s7 = smov [#allocation6]   ;;  %s248_s11 = scalar_lea.hbm %s397_s3, 256 }
  0x14   :  { %s34_s8 = sshll.u32 %s301_s7, 4  ;;  %p249_p8 = scmp.ne.s32.totalorder %s397_s3, %s248_s11  ;;  %s35_s8 = int_to_ptr.vmem [resolvable:$true] %s34_s8 }
  0x15   :  { %p252_p9 = scmp.lt.u32.totalorder %s248_s11, %s397_s3 }
  0x17   :  { %p254_p10 = pnand %p252_p9, %p249_p8 }
  0x19   :  { %257 = shalt.err (!%p254_p10)
}
  0x1a   :  { %s258_s16 = scalar_lea.vmem %s35_s8, 256  ;;  %p263_p12 = scmp.lt.s32.totalorder %s35_s8, %s35_s8 }
  0x1b   :  { %p259_p11 = scmp.ne.s32.totalorder %s35_s8, %s258_s16  ;;  %p264_p13 = scmp.lt.s32.totalorder %s258_s16, %s258_s16 }
  0x1d   :  { %p265_p0 = por %p264_p13, %p263_p12 }
  0x1f   :  { %p266_p1 = pnand %p265_p0, %p259_p11 }
  0x21   :  { %269 = shalt.err (!%p266_p1)
}
  0x22   :  { %s302_s0 = smov 64   ;;  %s303_s17 = smov 4  }
  0x23   :  { %40 = dma.hbm_to_vmem [thread:$0]  %s397_s3, 256, %s35_s8, [#allocation7], %s302_s0, %s302_s0, %s303_s17  }
  0x24   :  { %292 = dma.done.wait [#allocation4], 256  }
  0x25   :  { %293 = vsyncadd [#allocation4], 4294967040 }
  0x26   :  { %294 = dma.done.wait [#allocation7], 256  }
  0x27   :  { %295 = vsyncadd [#allocation7], 4294967040  ;;  %vm56_vm0 = vcmask 261120   ;;  %v54_v0 = vld [vmem:[#allocation3] sm:$0xff]  ;;  %v55_v1 = vld [vmem:[#allocation3 + $0x8] sm:$0xff]  ;;  %v304_v15 = vmov 0.0  }
  0x28   :  { %v57_v2 = vsel %vm56_vm0, %v54_v0, 0.0  ;;  %v60_v3 = vsel %vm56_vm0, %v55_v1, 0.0  ;;  %v220_v14 = vld [vmem:[#allocation6] sm:$0xff]   ;;  %203 = vmatprep.subr.bf16.mxu0 %v304_v15  ;;  %v221_v16 = vld [vmem:[#allocation6 + $0x8] sm:$0xff]   ;;  %vm305_vm1 = vmmov 0   ;;  %vm173_vm2 = vcmask 785408  }
  0x29   :  { %58 = vadd.xlane.f32.xlu0 %v57_v2  ;;  %204 = vmatpush3.bf16.msra.mxu0 %v220_v14  ;;  %v194_v25 = vld [vmem:[%s395_s1] ss:$0 sm:$0xff]  ;;  %s306_s1 = smov [#allocation8]  }
  0x2a   :  { %207 = vmatprep.mubr.msk.bf16.mxu0 %vm305_vm1, %v304_v15  ;;  %205 = vmatprep.subr.bf16.mxu0 %v304_v15  ;;  %v195_v29 = vld [vmem:[%s396_s2] ss:$0 sm:$0xff]  ;;  %s181_s25 = sshll.u32 %s306_s1, 4  ;;  %s182_s25 = int_to_ptr.vmem [resolvable:$true] %s181_s25 }
  0x2b   :  { %v196_v35 = vld [vmem:[%s398_s4] ss:$0 sm:$0xff]  ;;  %s270_s2 = scalar_lea.vmem %s182_s25, 256  ;;  %p275_p3 = scmp.lt.s32.totalorder %s182_s25, %s182_s25 }
  0x2c   :  { %p271_p2 = scmp.ne.s32.totalorder %s182_s25, %s270_s2  ;;  %p276_p4 = scmp.lt.s32.totalorder %s270_s2, %s270_s2 }
  0x2d   :  { %61 = vadd.xlane.f32.xlu0 %v60_v3  ;;  %206 = vmatpush3.bf16.msra.mxu0 %v221_v16 }
  0x2e   :  { %p277_p5 = por %p276_p4, %p275_p3 }
  0x30   :  { %p278_p6 = pnand %p277_p5, %p271_p2 }
  0xb6   :  { %v59_v4 = vpop.xlane.xlu0 %58 }
  0xb7   :  { %v64_v5 = vmul.f32 0.03125, %v59_v4 }
  0xb9   :  { %v66_v6 = vsub.f32 %v54_v0, %v64_v5 }
  0xba   :  { %v62_v7 = vpop.xlane.xlu0 %61 }
  0xbb   :  { %v65_v8 = vmul.f32 0.03125, %v62_v7  ;;  %v68_v9 = vmul.f32 %v66_v6, %v66_v6 }
  0xbd   :  { %v67_v10 = vsub.f32 %v55_v1, %v65_v8  ;;  %v70_v11 = vsel %vm56_vm0, %v68_v9, 0.0 }
  0xbe   :  { %71 = vadd.xlane.f32.xlu1 %v70_v11 }
  0xbf   :  { %v69_v12 = vmul.f32 %v67_v10, %v67_v10 }
  0xc1   :  { %v73_v13 = vsel %vm56_vm0, %v69_v12, 0.0 }
  0xc2   :  { %74 = vadd.xlane.f32.xlu1 %v73_v13 }
 0x14b   :  { %v72_v17 = vpop.xlane.xlu1 %71 }
 0x14c   :  { %v76_v18 = vmul.f32 0.03125, %v72_v17 }
 0x14e   :  { %v78_v19 = vadd.f32 1e-05, %v76_v18 }
 0x14f   :  { %v75_v20 = vpop.xlane.xlu1 %74 }
 0x150   :  { %222 = vrsqrt.f32 %v78_v19  ;;  %v77_v21 = vmul.f32 0.03125, %v75_v20 }
 0x152   :  { %v79_v22 = vadd.f32 1e-05, %v77_v21 }
 0x154   :  { %224 = vrsqrt.f32 %v79_v22 }
 0x15a   :  { %v223_v23 = vpop.eup %222 }
 0x15b   :  { %v82_v24 = vmul.f32 %v223_v23, %v66_v6 }
 0x15d   :  { %v91_v27 = vmul.f32 %v194_v25, %v82_v24 }
 0x15e   :  { %v225_v26 = vpop.eup %224 }
 0x15f   :  { %v83_v28 = vmul.f32 %v225_v26, %v67_v10  ;;  %v100_v31 = vadd.f32 %v195_v29, %v91_v27 }
 0x161   :  { %v92_v30 = vmul.f32 %v194_v25, %v83_v28 }
 0x163   :  { %v101_v32 = vadd.f32 %v195_v29, %v92_v30 }
 0x165   :  { %v102_v33 = vpack.c.bf16 %v101_v32, %v100_v31 }
 0x167   :  { %103 = vst.msk [vmem:[#allocation2] sm:$0xff] %vm56_vm0, %v102_v33 }
 0x16e   :  { %v104_v34 = vld [vmem:[#allocation2] sm:$0xff] }
 0x16f   :  { %208 = vmatmul.mubr.msk.bf16.vlgmr.msra.gmra.mrb[0].mxu0 %vm56_vm0, %v104_v34 }
 0x242   :  { %v166_v36 = vpop.f32.mrb[0].mxu0 }
 0x243   :  { %v167_v37 = vadd.f32 %v196_v35, %v166_v36  ;;  %v209_v38 = vpop.f32.mrb[1].mxu0 }
 0x244   :  { %v169_v39 = vpop.f32.mrb[2].mxu0 }
 0x245   :  { %v170_v40 = vadd.f32 %v196_v35, %v169_v39  ;;  %v210_v41 = vpop.f32.mrb[3].mxu0  ;;  %174 = vst.msk [vmem:[#allocation8] sm:$0xff] %vm173_vm2, %v167_v37 }
 0x247   :  { %175 = vst.msk [vmem:[#allocation8 + $0x8] sm:$0xff] %vm173_vm2, %v170_v40 }
 0x248   :  { %281 = shalt.err (!%p278_p6)
}
 0x249   :  { %s282_s27 = scalar_lea.hbm %s399_s5, 256 }
 0x24a   :  { %p283_p7 = scmp.ne.s32.totalorder %s399_s5, %s282_s27  ;;  %p286_p8 = scmp.lt.u32.totalorder %s282_s27, %s399_s5 }
 0x24c   :  { %p288_p9 = pnand %p286_p8, %p283_p7 }
 0x24e   :  { %291 = shalt.err (!%p288_p9)
}
 0x24f   :  { %187 = dma.vmem_to_hbm [thread:$0]  %s182_s25, 256, %s399_s5, [#allocation5], %s299_s28, %s299_s28, %s300_s29  }
 0x250   :  { %296 = dma.done.wait [#allocation5], 256  }
 0x251   :  { %297 = vsyncadd [#allocation5], 4294967040 }
 0x252   :  { %191 = vsyncpa [#allocation4], 1 }
 0x253   :  { %192 = vsyncpa [#allocation7], 1 }
 0x254   :  { %193 = vsyncpa [#allocation5], 1 }

</bundles_post_ra>
